<compile_context>
chip_gen: v5e
topology: v5e:2x2
jax: 0.10.0
libtpu: 0.0.40
codegen_flags: <defaults>
</compile_context>

<pallas_src>
import functools

import jax
import jax.numpy as jnp
from jax import lax
from jax.experimental import pallas as pl
from jax.experimental.pallas import tpu as pltpu

EPS = 1e-5
LANE = 128
NEG_BIG = -1e30


def _round_up(v, m):
    return (v + m - 1) // m * m


def _pick_tile_128(total, target):
    """Largest multiple of 128 dividing `total` (itself a 128-multiple), <= target."""
    target = max(LANE, min(total, target))
    target -= target % LANE
    for t in range(target, LANE - 1, -LANE):
        if total % t == 0:
            return t
    return LANE


# ---------------------------------------------------------------------------
# Prologue: g = conv_g(AdaIN(y)), h = conv_h(y)  ->  bf16 in HBM
# ---------------------------------------------------------------------------
def _gh_proj_kernel(y_ref, sy_ref, ty_ref, wg_ref, bg_ref, wh_ref, bh_ref,
                    g_ref, h_ref):
    y = y_ref[...].astype(jnp.float32)                      # (thw, Cp)
    yn = (y * sy_ref[...] + ty_ref[...]).astype(jnp.bfloat16)  # AdaIN, full-HW stats
    g = jnp.dot(yn, wg_ref[...], preferred_element_type=jnp.float32) + bg_ref[...]
    h = jnp.dot(y_ref[...], wh_ref[...], preferred_element_type=jnp.float32) + bh_ref[...]
    g_ref[...] = g.astype(jnp.bfloat16)
    h_ref[...] = h.astype(jnp.bfloat16)


# ---------------------------------------------------------------------------
# Fused f-projection + flash-style attention + out_conv + residual add.
# Grid = (batch, q_tiles, kv_blocks); the kv axis MUST stay innermost and
# "arbitrary": scratch/output are finalized only on its last step.
# ---------------------------------------------------------------------------
def _sanet_attn_kernel(x_ref, sx_ref, tx_ref, wf_ref, bf_ref, g_ref, h_ref,
                       wo_ref, bo_ref, out_ref, f_sc, m_sc, l_sc, acc_sc, *,
                       kv_block, kv_inner, hwy_real, mask_kv):
    kv = pl.program_id(2)

    # ---- first kv step: init flash stats and compute the f tile (fused) ----
    @pl.when(kv == 0)
    def _():
        m_sc[...] = jnp.full_like(m_sc, -jnp.inf)
        l_sc[...] = jnp.zeros_like(l_sc)
        acc_sc[...] = jnp.zeros_like(acc_sc)
        xn = x_ref[...] * sx_ref[...] + tx_ref[...]          # AdaIN(x) tile, f32
        f = jnp.dot(xn.astype(jnp.bfloat16), wf_ref[...],
                    preferred_element_type=jnp.float32) + bf_ref[...]
        f_sc[...] = f.astype(jnp.bfloat16)

    f = f_sc[...]                                            # (tq, Cp) bf16
    n_inner = kv_block // kv_inner

    def body(j, carry):
        m, l, acc = carry
        off = pl.multiple_of(j * kv_inner, kv_inner)
        g_blk = g_ref[pl.ds(off, kv_inner), :]               # (kv_inner, Cp) bf16
        h_blk = h_ref[pl.ds(off, kv_inner), :]
        # energy[i, j] = <f_i, g_j>: contract the channel axis of both
        # operands directly on the MXU (no transposed copy of g).
        s = lax.dot_general(f, g_blk, (((1,), (1,)), ((), ())),
                            preferred_element_type=jnp.float32)  # (tq, kv_inner)
        if mask_kv:  # trace-time: only emitted when HWy was padded
            col = (lax.broadcasted_iota(jnp.int32, s.shape, 1)
                   + kv * kv_block + j * kv_inner)
            s = jnp.where(col < hwy_real, s, NEG_BIG)
        m_new = jnp.maximum(m, jnp.max(s, axis=-1, keepdims=True))
        alpha = jnp.exp(m - m_new)
        p = jnp.exp(s - m_new)                               # unnormalized softmax
        l = alpha * l + jnp.sum(p, axis=-1, keepdims=True)
        acc = alpha * acc + jnp.dot(p.astype(jnp.bfloat16), h_blk,
                                    preferred_element_type=jnp.float32)
        return m_new, l, acc

    carry0 = (m_sc[...], l_sc[...], acc_sc[...])
    m, l, acc = lax.fori_loop(0, n_inner, body, carry0, unroll=n_inner <= 4)
    m_sc[...] = m
    l_sc[...] = l
    acc_sc[...] = acc

    # ---- last kv step: deferred normalization, out_conv, residual add ----
    @pl.when(kv == pl.num_programs(2) - 1)
    def _():
        resid = acc_sc[...] * pl.reciprocal(l_sc[...], approx=True)
        resid = jnp.dot(resid.astype(jnp.bfloat16), wo_ref[...],
                        preferred_element_type=jnp.float32) + bo_ref[...]
        out_ref[...] = x_ref[...] + resid


# ---------------------------------------------------------------------------
# Wrapper
# ---------------------------------------------------------------------------
def sanet_forward(x_nchw, y_nchw, params, *,
                  q_tile=512, kv_inner=512, kv_tile=2048, proj_tile=1024,
                  gh_vmem_budget=16 << 20):
    """x_nchw, y_nchw: (N, C, H, W) float32. Returns (N, C, H, W) float32."""
    N, C, H, W = x_nchw.shape
    Ny, Cy, Hy, Wy = y_nchw.shape
    assert N == Ny and C == Cy
    HWx, HWy = H * W, Hy * Wy
    Cp = _round_up(max(C, LANE), LANE)                       # lane-dense channels

    # ---- tiling (all 128-multiples) --------------------------------------
    tq = _round_up(max(LANE, min(q_tile, _round_up(HWx, LANE))), LANE)
    HWx_p = _round_up(HWx, tq)

    kv_inner = _round_up(max(LANE, min(kv_inner, _round_up(HWy, LANE))), LANE)
    resident_bytes = 2 * 2 * _round_up(HWy, kv_inner) * Cp * 2   # g+h, 2 bufs, bf16
    if resident_bytes <= gh_vmem_budget:
        kv_block = _round_up(HWy, kv_inner)      # single kv grid step: g/h resident
    else:
        kv_block = _round_up(max(kv_inner, min(kv_tile, _round_up(HWy, LANE))),
                             kv_inner)
    HWy_p = _round_up(HWy, kv_block)
    num_kv = HWy_p // kv_block
    assert HWx_p % tq == 0 and HWy_p % kv_block == 0 and kv_block % kv_inner == 0

    # ---- layout: NCHW -> channels-last, AdaIN affine from FULL extent ----
    def to_cl(t, HW):
        return jnp.transpose(t.reshape(N, C, HW), (0, 2, 1)).astype(jnp.float32)

    x_cl = to_cl(x_nchw, HWx)
    y_cl = to_cl(y_nchw, HWy)

    def adain_affine(t):                          # stats over unpadded spatial extent
        mean = jnp.mean(t, axis=1, keepdims=True)
        var = jnp.mean(jnp.square(t - mean), axis=1, keepdims=True)
        rstd = lax.rsqrt(var + EPS)
        return rstd, -mean * rstd                 # scale, shift  (N, 1, C)

    sx, tx = adain_affine(x_cl)
    sy, ty = adain_affine(y_cl)

    pad_c = Cp - C
    x_cl = jnp.pad(x_cl, ((0, 0), (0, HWx_p - HWx), (0, pad_c)))
    y_cl = jnp.pad(y_cl, ((0, 0), (0, HWy_p - HWy), (0, pad_c))).astype(jnp.bfloat16)
    sx = jnp.pad(sx, ((0, 0), (0, 0), (0, pad_c)))
    tx = jnp.pad(tx, ((0, 0), (0, 0), (0, pad_c)))
    sy = jnp.pad(sy, ((0, 0), (0, 0), (0, pad_c)))
    ty = jnp.pad(ty, ((0, 0), (0, 0), (0, pad_c)))

    def wt(w):   # Conv2d(k=1) weight (Cout, Cin, 1, 1) -> (Cin, Cout) bf16, padded
        wm = jnp.transpose(w.reshape(w.shape[0], w.shape[1]), (1, 0))
        return jnp.pad(wm, ((0, pad_c), (0, pad_c))).astype(jnp.bfloat16)

    def bt(b):
        return jnp.pad(b.reshape(1, -1).astype(jnp.float32), ((0, 0), (0, pad_c)))

    wf, bf = wt(params["f_w"]), bt(params["f_b"])
    wg, bg = wt(params["g_w"]), bt(params["g_b"])
    wh, bh = wt(params["h_w"]), bt(params["h_b"])
    wo, bo = wt(params["out_w"]), bt(params["out_b"])

    # ---- prologue pallas_call: g, h ---------------------------------------
    tpy = _pick_tile_128(HWy_p, proj_tile)
    g, h = pl.pallas_call(
        _gh_proj_kernel,
        out_shape=(jax.ShapeDtypeStruct((N, HWy_p, Cp), jnp.bfloat16),
                   jax.ShapeDtypeStruct((N, HWy_p, Cp), jnp.bfloat16)),
        grid=(N, HWy_p // tpy),
        in_specs=[
            pl.BlockSpec((None, tpy, Cp), lambda b, t: (b, t, 0)),   # y (bf16)
            pl.BlockSpec((None, 1, Cp), lambda b, t: (b, 0, 0)),     # sy
            pl.BlockSpec((None, 1, Cp), lambda b, t: (b, 0, 0)),     # ty
            pl.BlockSpec((Cp, Cp), lambda b, t: (0, 0)),             # wg
            pl.BlockSpec((1, Cp), lambda b, t: (0, 0)),              # bg
            pl.BlockSpec((Cp, Cp), lambda b, t: (0, 0)),             # wh
            pl.BlockSpec((1, Cp), lambda b, t: (0, 0)),              # bh
        ],
        out_specs=(pl.BlockSpec((None, tpy, Cp), lambda b, t: (b, t, 0)),
                   pl.BlockSpec((None, tpy, Cp), lambda b, t: (b, t, 0))),
        compiler_params=pltpu.CompilerParams(
            dimension_semantics=("parallel", "parallel"),
            vmem_limit_bytes=32 << 20),
    )(y_cl, sy, ty, wg, bg, wh, bh)

    # ---- attention pallas_call ---------------------------------------------
    attn_kernel = functools.partial(
        _sanet_attn_kernel, kv_block=kv_block, kv_inner=kv_inner,
        hwy_real=HWy, mask_kv=(HWy_p != HWy))

    # VMEM budget from actual block sizes (double-buffered inputs/outputs),
    # clamped to [32, 64] MiB so we never request more than v7x's physical VMEM.
    attn_vmem = (2 * tq * Cp * 4                 # x  (f32)
                 + 2 * tq * Cp * 4               # out
                 + 2 * 2 * kv_block * Cp * 2     # g + h (bf16)
                 + 2 * 2 * Cp * Cp * 2           # wf + wo
                 + tq * Cp * (2 + 4)             # f + acc scratch
                 + tq * kv_inner * 12)           # s/p intermediates + slack
    attn_vmem = int(min(max(attn_vmem + (8 << 20), 32 << 20), 64 << 20))

    out_cl = pl.pallas_call(
        attn_kernel,
        out_shape=jax.ShapeDtypeStruct((N, HWx_p, Cp), jnp.float32),
        grid=(N, HWx_p // tq, num_kv),
        in_specs=[
            pl.BlockSpec((None, tq, Cp), lambda b, q, k: (b, q, 0)),        # x
            pl.BlockSpec((None, 1, Cp), lambda b, q, k: (b, 0, 0)),         # sx
            pl.BlockSpec((None, 1, Cp), lambda b, q, k: (b, 0, 0)),         # tx
            pl.BlockSpec((Cp, Cp), lambda b, q, k: (0, 0)),                 # wf
            pl.BlockSpec((1, Cp), lambda b, q, k: (0, 0)),                  # bf
            pl.BlockSpec((None, kv_block, Cp), lambda b, q, k: (b, k, 0)),  # g
            pl.BlockSpec((None, kv_block, Cp), lambda b, q, k: (b, k, 0)),  # h
            pl.BlockSpec((Cp, Cp), lambda b, q, k: (0, 0)),                 # wo
            pl.BlockSpec((1, Cp), lambda b, q, k: (0, 0)),                  # bo
        ],
        out_specs=pl.BlockSpec((None, tq, Cp), lambda b, q, k: (b, q, 0)),
        scratch_shapes=[
            pltpu.VMEM((tq, Cp), jnp.bfloat16),   # fused f tile (reused over kv)
            pltpu.VMEM((tq, 1), jnp.float32),     # running max
            pltpu.VMEM((tq, 1), jnp.float32),     # running sum
            pltpu.VMEM((tq, Cp), jnp.float32),    # output accumulator
        ],
        compiler_params=pltpu.CompilerParams(
            dimension_semantics=("parallel", "parallel", "arbitrary"),
            vmem_limit_bytes=attn_vmem),
    )(x_cl, sx, tx, wf, bf, g, h, wo, bo)

    out = out_cl[:, :HWx, :C]
    return jnp.transpose(out, (0, 2, 1)).reshape(N, C, H, W)


# ---------------------------------------------------------------------------
# Plain-JAX reference (f32) mirroring the PyTorch forward
# ---------------------------------------------------------------------------
def sanet_reference(x, y, params):
    N, C, H, W = x.shape
    Hy, Wy = y.shape[2], y.shape[3]

    def adain(t):
        m = jnp.mean(t, axis=(2, 3), keepdims=True)
        v = jnp.mean((t - m) ** 2, axis=(2, 3), keepdims=True)
        return (t - m) / jnp.sqrt(v + EPS)

    def conv1x1(t, w, b):
        wm = w.reshape(w.shape[0], w.shape[1])
        return jnp.einsum("oi,nihw->nohw", wm, t) + b.reshape(1, -1, 1, 1)

    xn, yn = adain(x), adain(y)
    f = conv1x1(xn, params["f_w"], params["f_b"]).reshape(N, C, H * W)
    g = conv1x1(yn, params["g_w"], params["g_b"]).reshape(N, C, Hy * Wy)
    energy = jnp.einsum("ncq,nck->nqk", f, g)             # (N, HWx, HWy)
    corr = jax.nn.softmax(energy, axis=-1)
    h = conv1x1(y, params["h_w"], params["h_b"]).reshape(N, C, Hy * Wy)
    residual = jnp.einsum("ncj,nqj->ncq", h, corr).reshape(N, C, H, W)
    residual = conv1x1(residual, params["out_w"], params["out_b"])
    return x + residual


def make_params(key, C):
    ks = jax.random.split(key, 8)
    s = 0.2
    return {
        "f_w": s * jax.random.normal(ks[0], (C, C, 1, 1), jnp.float32),
        "f_b": s * jax.random.normal(ks[1], (C,), jnp.float32),
        "g_w": s * jax.random.normal(ks[2], (C, C, 1, 1), jnp.float32),
        "g_b": s * jax.random.normal(ks[3], (C,), jnp.float32),
        "h_w": s * jax.random.normal(ks[4], (C, C, 1, 1), jnp.float32),
        "h_b": s * jax.random.normal(ks[5], (C,), jnp.float32),
        "out_w": s * jax.random.normal(ks[6], (C, C, 1, 1), jnp.float32),
        "out_b": s * jax.random.normal(ks[7], (C,), jnp.float32),
    }


if __name__ == "__main__":
    key = jax.random.PRNGKey(0)
    kx, ky, kp, kx2, ky2 = jax.random.split(key, 5)

    N, C, H, W = 2, 4, 16, 16
    x = jax.random.normal(kx, (N, C, H, W), jnp.float32)
    y = jax.random.normal(ky, (N, C, H, W), jnp.float32)
    params = make_params(kp, C)
    ref = jax.block_until_ready(sanet_reference(x, y, params))

    def check(out, ref_):
        assert out.shape == ref_.shape
        err = float(jnp.max(jnp.abs(out - ref_)))
        # bf16 MXU matmuls + approx reciprocal -> relaxed tolerance vs f32 ref.
        assert err < 5e-2, f"mismatch vs reference: max abs err = {err}"

    # 1) Resident-g/h path: kv grid collapses to one step; HW=256 -> 2 q-tiles
    #    and 2 in-kernel kv chunks per tile are exercised.
    out = jax.block_until_ready(
        sanet_forward(x, y, params, q_tile=128, kv_inner=128))
    check(out, ref)

    # 2) Streaming fallback: g/h re-fetched per kv grid step, flash-style
    #    accumulation across the "arbitrary" kv axis (forced via budget=0).
    out = jax.block_until_ready(
        sanet_forward(x, y, params, q_tile=128, kv_inner=128, kv_tile=128,
                      gh_vmem_budget=0))
    check(out, ref)

    # 3) Non-128-divisible spatial extent: exercises HW padding + key masking.
    H2 = W2 = 10
    x2 = jax.random.normal(kx2, (N, C, H2, W2), jnp.float32)
    y2 = jax.random.normal(ky2, (N, C, H2, W2), jnp.float32)
    ref2 = jax.block_until_ready(sanet_reference(x2, y2, params))
    out2 = jax.block_until_ready(sanet_forward(x2, y2, params))
    check(out2, ref2)

    print("KERNEL_OK")
</pallas_src>

<mosaic_0001>
module attributes {stable_mosaic.version = 11 : i64} {
  func.func @_gh_proj_kernel(%arg0: i32, %arg1: i32, %arg2: memref<1x256x128xbf16, #tpu.memory_space<vmem>>, %arg3: memref<1x1x128xf32, #tpu.memory_space<vmem>>, %arg4: memref<1x1x128xf32, #tpu.memory_space<vmem>>, %arg5: memref<128x128xbf16, #tpu.memory_space<vmem>>, %arg6: memref<1x128xf32, #tpu.memory_space<vmem>>, %arg7: memref<128x128xbf16, #tpu.memory_space<vmem>>, %arg8: memref<1x128xf32, #tpu.memory_space<vmem>>, %arg9: memref<1x256x128xbf16, #tpu.memory_space<vmem>>, %arg10: memref<1x256x128xbf16, #tpu.memory_space<vmem>>) attributes {dimension_semantics = [#tpu.dimension_semantics<parallel>, #tpu.dimension_semantics<parallel>], iteration_bounds = array<i64: 2, 1>, scalar_prefetch = 0 : i64, scratch_operands = 0 : i64, tpu.core_type = #tpu.core_type<tc>, window_params = [{transform_indices = @transform_0, window_bounds = array<i64: 1, 256, 128>}, {transform_indices = @transform_1, window_bounds = array<i64: 1, 1, 128>}, {transform_indices = @transform_2, window_bounds = array<i64: 1, 1, 128>}, {pipeline_mode = #tpu.pipeline_mode<synchronous>, transform_indices = @transform_3, window_bounds = array<i64: 128, 128>}, {pipeline_mode = #tpu.pipeline_mode<synchronous>, transform_indices = @transform_4, window_bounds = array<i64: 1, 128>}, {pipeline_mode = #tpu.pipeline_mode<synchronous>, transform_indices = @transform_5, window_bounds = array<i64: 128, 128>}, {pipeline_mode = #tpu.pipeline_mode<synchronous>, transform_indices = @transform_6, window_bounds = array<i64: 1, 128>}, {transform_indices = @transform_7, window_bounds = array<i64: 1, 256, 128>}, {transform_indices = @transform_8, window_bounds = array<i64: 1, 256, 128>}]} {
    %c0 = arith.constant 0 : index
    %c0_0 = arith.constant 0 : index
    %c0_1 = arith.constant 0 : index
    %0 = vector.load %arg2[%c0, %c0_0, %c0_1] : memref<1x256x128xbf16, #tpu.memory_space<vmem>>, vector<1x256x128xbf16>
    %1 = vector.shape_cast %0 : vector<1x256x128xbf16> to vector<256x128xbf16>
    %2 = arith.extf %1 : vector<256x128xbf16> to vector<256x128xf32>
    %c0_2 = arith.constant 0 : index
    %c0_3 = arith.constant 0 : index
    %c0_4 = arith.constant 0 : index
    %3 = vector.load %arg3[%c0_2, %c0_3, %c0_4] : memref<1x1x128xf32, #tpu.memory_space<vmem>>, vector<1x1x128xf32>
    %4 = vector.shape_cast %3 : vector<1x1x128xf32> to vector<1x128xf32>
    %5 = vector.broadcast %4 : vector<1x128xf32> to vector<256x128xf32>
    %6 = arith.mulf %2, %5 : vector<256x128xf32>
    %c0_5 = arith.constant 0 : index
    %c0_6 = arith.constant 0 : index
    %c0_7 = arith.constant 0 : index
    %7 = vector.load %arg4[%c0_5, %c0_6, %c0_7] : memref<1x1x128xf32, #tpu.memory_space<vmem>>, vector<1x1x128xf32>
    %8 = vector.shape_cast %7 : vector<1x1x128xf32> to vector<1x128xf32>
    %9 = vector.broadcast %8 : vector<1x128xf32> to vector<256x128xf32>
    %10 = arith.addf %6, %9 : vector<256x128xf32>
    %11 = arith.truncf %10 : vector<256x128xf32> to vector<256x128xbf16>
    %c0_8 = arith.constant 0 : index
    %c0_9 = arith.constant 0 : index
    %12 = vector.load %arg5[%c0_8, %c0_9] : memref<128x128xbf16, #tpu.memory_space<vmem>>, vector<128x128xbf16>
    %cst = arith.constant dense<0.000000e+00> : vector<256x128xf32>
    %13 = tpu.matmul %11, %12, %cst {dimension_numbers = #tpu.dot_dimension_numbers<[1], [0], [0], [1], [0, 0, 1, 1], [], []>} : vector<256x128xbf16>, vector<128x128xbf16>, vector<256x128xf32> -> vector<256x128xf32>
    %c0_10 = arith.constant 0 : index
    %c0_11 = arith.constant 0 : index
    %14 = vector.load %arg6[%c0_10, %c0_11] : memref<1x128xf32, #tpu.memory_space<vmem>>, vector<1x128xf32>
    %15 = vector.broadcast %14 : vector<1x128xf32> to vector<256x128xf32>
    %16 = arith.addf %13, %15 : vector<256x128xf32>
    %c0_12 = arith.constant 0 : index
    %c0_13 = arith.constant 0 : index
    %c0_14 = arith.constant 0 : index
    %17 = vector.load %arg2[%c0_12, %c0_13, %c0_14] : memref<1x256x128xbf16, #tpu.memory_space<vmem>>, vector<1x256x128xbf16>
    %18 = vector.shape_cast %17 : vector<1x256x128xbf16> to vector<256x128xbf16>
    %c0_15 = arith.constant 0 : index
    %c0_16 = arith.constant 0 : index
    %19 = vector.load %arg7[%c0_15, %c0_16] : memref<128x128xbf16, #tpu.memory_space<vmem>>, vector<128x128xbf16>
    %cst_17 = arith.constant dense<0.000000e+00> : vector<256x128xf32>
    %20 = tpu.matmul %18, %19, %cst_17 {dimension_numbers = #tpu.dot_dimension_numbers<[1], [0], [0], [1], [0, 0, 1, 1], [], []>} : vector<256x128xbf16>, vector<128x128xbf16>, vector<256x128xf32> -> vector<256x128xf32>
    %c0_18 = arith.constant 0 : index
    %c0_19 = arith.constant 0 : index
    %21 = vector.load %arg8[%c0_18, %c0_19] : memref<1x128xf32, #tpu.memory_space<vmem>>, vector<1x128xf32>
    %22 = vector.broadcast %21 : vector<1x128xf32> to vector<256x128xf32>
    %23 = arith.addf %20, %22 : vector<256x128xf32>
    %24 = arith.truncf %16 : vector<256x128xf32> to vector<256x128xbf16>
    %c0_20 = arith.constant 0 : index
    %c0_21 = arith.constant 0 : index
    %c0_22 = arith.constant 0 : index
    %25 = vector.load %arg9[%c0_20, %c0_21, %c0_22] : memref<1x256x128xbf16, #tpu.memory_space<vmem>>, vector<1x256x128xbf16>
    %26 = vector.shape_cast %25 : vector<1x256x128xbf16> to vector<256x128xbf16>
    %27 = vector.shape_cast %24 : vector<256x128xbf16> to vector<1x256x128xbf16>
    tpu.vector_store %arg9[%c0_20, %c0_21, %c0_22], %27 {strides = array<i32>} : memref<1x256x128xbf16, #tpu.memory_space<vmem>>, vector<1x256x128xbf16>,
    %28 = arith.truncf %23 : vector<256x128xf32> to vector<256x128xbf16>
    %c0_23 = arith.constant 0 : index
    %c0_24 = arith.constant 0 : index
    %c0_25 = arith.constant 0 : index
    %29 = vector.load %arg10[%c0_23, %c0_24, %c0_25] : memref<1x256x128xbf16, #tpu.memory_space<vmem>>, vector<1x256x128xbf16>
    %30 = vector.shape_cast %29 : vector<1x256x128xbf16> to vector<256x128xbf16>
    %31 = vector.shape_cast %28 : vector<256x128xbf16> to vector<1x256x128xbf16>
    tpu.vector_store %arg10[%c0_23, %c0_24, %c0_25], %31 {strides = array<i32>} : memref<1x256x128xbf16, #tpu.memory_space<vmem>>, vector<1x256x128xbf16>,
    return
  }
  func.func @transform_0(%arg0: i32, %arg1: i32) -> (i32, i32, i32) {
    %c0_i32 = arith.constant 0 : i32
    %c0_i32_0 = arith.constant 0 : i32
    return %arg0, %arg1, %c0_i32 : i32, i32, i32
  }
  func.func @transform_1(%arg0: i32, %arg1: i32) -> (i32, i32, i32) {
    %c0_i32 = arith.constant 0 : i32
    %c0_i32_0 = arith.constant 0 : i32
    %c0_i32_1 = arith.constant 0 : i32
    return %arg0, %c0_i32, %c0_i32_0 : i32, i32, i32
  }
  func.func @transform_2(%arg0: i32, %arg1: i32) -> (i32, i32, i32) {
    %c0_i32 = arith.constant 0 : i32
    %c0_i32_0 = arith.constant 0 : i32
    %c0_i32_1 = arith.constant 0 : i32
    return %arg0, %c0_i32, %c0_i32_0 : i32, i32, i32
  }
  func.func @transform_3(%arg0: i32, %arg1: i32) -> (i32, i32) {
    %c0_i32 = arith.constant 0 : i32
    %c0_i32_0 = arith.constant 0 : i32
    %c0_i32_1 = arith.constant 0 : i32
    return %c0_i32, %c0_i32_0 : i32, i32
  }
  func.func @transform_4(%arg0: i32, %arg1: i32) -> (i32, i32) {
    %c0_i32 = arith.constant 0 : i32
    %c0_i32_0 = arith.constant 0 : i32
    %c0_i32_1 = arith.constant 0 : i32
    return %c0_i32, %c0_i32_0 : i32, i32
  }
  func.func @transform_5(%arg0: i32, %arg1: i32) -> (i32, i32) {
    %c0_i32 = arith.constant 0 : i32
    %c0_i32_0 = arith.constant 0 : i32
    %c0_i32_1 = arith.constant 0 : i32
    return %c0_i32, %c0_i32_0 : i32, i32
  }
  func.func @transform_6(%arg0: i32, %arg1: i32) -> (i32, i32) {
    %c0_i32 = arith.constant 0 : i32
    %c0_i32_0 = arith.constant 0 : i32
    %c0_i32_1 = arith.constant 0 : i32
    return %c0_i32, %c0_i32_0 : i32, i32
  }
  func.func @transform_7(%arg0: i32, %arg1: i32) -> (i32, i32, i32) {
    %c0_i32 = arith.constant 0 : i32
    %c0_i32_0 = arith.constant 0 : i32
    return %arg0, %arg1, %c0_i32 : i32, i32, i32
  }
  func.func @transform_8(%arg0: i32, %arg1: i32) -> (i32, i32, i32) {
    %c0_i32 = arith.constant 0 : i32
    %c0_i32_0 = arith.constant 0 : i32
    return %arg0, %arg1, %c0_i32 : i32, i32, i32
  }
}

</mosaic_0001>

<bundles_post_ra>
// kernel: tpu_custom_call.1
= control target key start
LH: loop header
LB: loop body
LE: loop exit
PB: predicated region body
PF: predicated region fallthrough
CT: control target
= control target key end

     0   :  { %s2628_s0 = inlined_call_operand.hbm [shape: bf16[2,256,128], index: 0, kind: input, shape index: {}]   ;;  %s2629_s1 = inlined_call_operand.hbm [shape: f32[2,1,128], index: 1, kind: input, shape index: {}]   ;;  %s2630_s2 = inlined_call_operand.hbm [shape: f32[2,1,128], index: 2, kind: input, shape index: {}]   ;;  %s2631_s3 = inlined_call_operand.hbm [shape: bf16[128,128], index: 3, kind: input, shape index: {}]   ;;  %s2632_s4 = inlined_call_operand.vmem [shape: f32[1,128], index: 4, kind: input, shape index: {}]   ;;  %s2633_s5 = inlined_call_operand.hbm [shape: bf16[128,128], index: 5, kind: input, shape index: {}]   ;;  %s2634_s6 = inlined_call_operand.vmem [shape: f32[1,128], index: 6, kind: input, shape index: {}]   ;;  %s2635_s7 = inlined_call_operand.hbm [shape: bf16[2,256,128], index: 7, kind: output, shape index: {0}]   ;;  %s2636_s8 = inlined_call_operand.hbm [shape: bf16[2,256,128], index: 8, kind: output, shape index: {1}]  }
   0x1   :  { %2650 = sst [smem:[#allocation26_spill]] %s2629_s1 }
   0x2   :  { %2651 = sst [smem:[#allocation27_spill]] %s2631_s3 }
   0x3   :  { %2652 = sst [smem:[#allocation28_spill]] %s2633_s5 }
   0x4   :  { %2653 = sst [smem:[#allocation29_spill]] %s2636_s8 }
   0x5   :  { %14 = vsyncpa [#allocation3], 0 }
   0x6   :  { %16 = vsyncpa [#allocation3 + $0x1], 0 }
   0x7   :  { %17 = vsyncpa [#allocation6], 0 }
   0x8   :  { %19 = vsyncpa [#allocation6 + $0x1], 0 }
   0x9   :  { %20 = vsyncpa [#allocation9], 0 }
   0xa   :  { %21 = vsyncpa [#allocation4], 0 }
   0xb   :  { %23 = vsyncpa [#allocation4 + $0x1], 0 }
   0xc   :  { %24 = vsyncpa [#allocation13], 0 }
   0xd   :  { %26 = vsyncpa [#allocation13 + $0x1], 0  ;;  %s2192_s27 = smov 0   ;;  %s2194_s28 = smov 0  }
   0xe   :  { %s2196_s29 = smov 0   ;;  %s2198_s30 = smov 0  }
   0xf   :  { %s2200_s9 = smov 0   ;;  %s2202_s10 = smov 0  }
  0x10 LB: > { %2654 = sst [smem:[#allocation19_spill]] %s2119_s27  ;;  %s2223_s11 = sadd.s32 4294967295, %s2139_s10   ;;  %s2139_s10 = sphi %s2202_s10, %s32_s10   ;;  %s2135_s9 = sphi %s2200_s9, %s2684_s9   ;;  %s2131_s30 = sphi %s2198_s30, %s2683_s30   ;;  %s2127_s29 = sphi %s2196_s29, %s2679_s29   ;;  %s2123_s28 = sphi %s2194_s28, %s2682_s28   ;;  %s2119_s27 = sphi %s2192_s27, %s2681_s27  }
  0x11   : > { %2655 = sst [smem:[#allocation20_spill]] %s2127_s29  ;;  %p1371_p0 = scmp.ge.s32.totalorder %s2139_s10, 1 }
  0x12   : > { %2656 = sst [smem:[#allocation21_spill]] %s2139_s10  ;;  %p67_p1 = scmp.eq.s32.totalorder %s2223_s11, 0 }
  0x13   : > { %p269_p2 = scmp.lt.s32.totalorder %s2139_s10, 3  ;;  %s2657_s3 = sld [smem:[#allocation27_spill]] }
  0x14   : > { %s2141_s16 = smov [#allocation8]   ;;  %s2637_s19 = smov 64  }
  0x15   : > { %p2231_p3 = pnand %p1371_p0, %p269_p2  ;;  %s282_s17 = sshll.u32 %s2141_s16, 4  ;;  %s283_s17 = int_to_ptr.vmem [resolvable:$true] %s282_s17 }
  0x16   : > { %s2639_s20 = smov 4   ;;  %s1370_s21 = sadd.s32 4294967294, %s2139_s10  }
  0x17   : > { %p1779_p4 = pneg %p2231_p3  ;;  %s44_s22 = sadd.s32 1, %s2135_s9 }
  0x18   : > { %s53_s23 = sadd.s32 1, %s2127_s29  ;;  %p46_p7 = scmp.ge.s32.totalorder %s44_s22, 2 }
  0x19   : > { %s280_s14 = sshll.u32 %s2657_s3, 4  ;;  %p2239_p5 = pnand %p1779_p4, %p67_p1  ;;  %s281_s14 = int_to_ptr.hbm [resolvable:$true] %s280_s14 }
  0x1a   : > { %p60_p8 = scmp.ne.s32.totalorder %s2127_s29, %s2123_s28  ;;  %p61_p9 = scmp.eq.s32.totalorder %s2139_s10, 0 }
  0x1b   : > { %1782 = dma.hbm_to_vmem [thread:$0]  (!%p2239_p5), %s281_s14, 1024, %s283_s17, [#allocation9], %s2637_s19, %s2637_s19, %s2639_s20  }
  0x1c   : > { %p66_p10 = scmp.ne.s32.totalorder %s2123_s28, %s2119_s27  ;;  %s2686_s22 = smov (%p46_p7, %s44_s22), 0 }
  0x1d   : > { %2660 = sst [smem:[#allocation22_spill]] %s2686_s22  ;;  %p62_p11 = por %p61_p9, %p60_p8 }
  0x1e   : > { %p2261_p12 = por %p67_p1, %p66_p10  ;;  %s48_s25 = ssub.s32 %s2135_s9, %s2686_s22 }
  0x1f   : > { %p228_p13 = scmp.eq.s32.totalorder %s2223_s11, 1  ;;  %p51_p0 = scmp.eq.s32.totalorder %s48_s25, 0 }
  0x20   : > { %p234_p2 = scmp.eq.s32.totalorder %s1370_s21, 1  ;;  %p1805_p6 = scmp.lt.s32.totalorder %s2139_s10, 2 }
  0x21   : > { %p2268_p4 = por %p228_p13, %p60_p8  ;;  %s2281_s14 = sand.u32 1, %s2127_s29  }
  0x22   : > { %s2274_s12 = scalar_select %p51_p0, %s2127_s29, %s53_s23  }
  0x23   : > { %s2662_s26 = scalar_select %p2268_p4, 1, 0 }
  0x24   : > { %2664 = sst [smem:[#allocation24_spill]] %s2274_s12  ;;  %p2276_p7 = por %p234_p2, %p66_p10 }
  0x25   : > { %2663 = sst [smem:[#allocation23_spill]] %s2662_s26  ;;  %p2283_p9 = pnand %p1805_p6, %p62_p11 }
  0x26   : > { %s2665_s13 = scalar_select %p2276_p7, 1, 0 }
  0x27   : > { %s340_s17 = sand.u32 1, %s2139_s10   ;;  %s2668_s1 = sld [smem:[#allocation26_spill]] }
  0x28   : > { %2666 = sst [smem:[#allocation25_spill]] %s2665_s13  ;;  %s343_s20 = scalar_lea.vmem [#allocation5], %s2281_s14 }
  0x29   : > { %s350_s3 = sshll.u32 %s343_s20, 4  ;;  %s341_s22 = scalar_lea.sflag [#allocation6], %s340_s17  ;;  %s351_s3 = int_to_ptr.vmem [resolvable:$true] %s350_s3 }
  0x2a   : > { %s2669_s5 = sld [smem:[#allocation28_spill]]  ;;  %s2144_s10 = smov [#allocation10]  }
  0x2b   : > { %s299_s21 = sshll.u32 %s2144_s10, 4  ;;  %s2670_s25 = smov 4   ;;  %s300_s21 = int_to_ptr.vmem [resolvable:$true] %s299_s21 }
  0x2c   : > { %s2671_s20 = smov 64   ;;  %s1375_s17 = sshll.u32 %s2281_s14, 7 }
  0x2d   : > { %s346_s23 = scalar_lea.hbm %s2668_s1, %s2135_s9  ;;  %s320_s1 = scalar_lea.vmem [#allocation2], %s1375_s17 }
  0x2e   : > { %s348_s19 = sshll.u32 %s346_s23, 4  ;;  %s1520_s23 = sshll.u32 %s2135_s9, 7  ;;  %s349_s19 = int_to_ptr.hbm [resolvable:$true] %s348_s19 }
  0x2f   : > { %1792 = dma.hbm_to_vmem [thread:$0]  (!%p2283_p9), %s349_s19, 16, %s351_s3, %s341_s22  }
  0x30   : > { %s297_s13 = sshll.u32 %s2669_s5, 4  ;;  %s327_s29 = scalar_lea.hbm %s2628_s0, %s1520_s23  ;;  %s298_s13 = int_to_ptr.hbm [resolvable:$true] %s297_s13 }
  0x31   : > { %1785 = dma.hbm_to_vmem [thread:$0]  (!%p2239_p5), %s298_s13, 1024, %s300_s21, [#allocation9], %s2671_s20, %s2671_s20, %s2670_s25  }
  0x32   : > { %s328_s12 = sshll.u32 %s327_s29, 4  ;;  %s330_s5 = sshll.u32 %s320_s1, 4  ;;  %s329_s12 = int_to_ptr.hbm [resolvable:$true] %s328_s12  ;;  %s331_s5 = int_to_ptr.vmem [resolvable:$true] %s330_s5 }
  0x33   : > { %s317_s27 = scalar_lea.sflag [#allocation3], %s2281_s14  ;;  %s363_s13 = scalar_lea.hbm %s2630_s2, %s2135_s9 }
  0x34   : > { %1789 = dma.hbm_to_vmem [thread:$0]  (!%p2283_p9), %s329_s12, 2048, %s331_s5, %s317_s27, %s2671_s20, %s2671_s20, %s2670_s25  }
  0x35   : > { %s365_s21 = sshll.u32 %s363_s13, 4  ;;  %s360_s26 = scalar_lea.vmem [#allocation7], %s2281_s14  ;;  %s366_s21 = int_to_ptr.hbm [resolvable:$true] %s365_s21 }
  0x36   : > { %s367_s8 = sshll.u32 %s360_s26, 4  ;;  %376 = sbr.rel (%p2231_p3) target bundleno = 370 (0x172), region = 48  ;;  %s368_s8 = int_to_ptr.vmem [resolvable:$true] %s367_s8 }
  0x37   : > { %1795 = dma.hbm_to_vmem [thread:$0]  (!%p2283_p9), %s366_s21, 16, %s368_s8, %s341_s22  }
  0x38   : > { %s2324_s1 = sand.u32 (!%p2231_p3), 1, %s2123_s28  }
  0x39   : > { %s2327_s5 = sshll.u32 (!%p2231_p3), %s2324_s1, 7  ;;  %s379_s27 = scalar_lea.sflag (!%p2231_p3), [#allocation3], %s2324_s1 }
  0x3a   : > { %s2331_s25 = scalar_lea.vmem (!%p2231_p3), [#allocation2], %s2327_s5 }
  0x3b   : > { %2098 = dma.done.wait (%p2261_p12), %s379_s27, 2048  }
  0x3c   : > { %2100 = vsyncadd (%p2261_p12), %s379_s27, 4294965248  ;;  %s388_s8 = sand.u32 1, %s2223_s11   ;;  %s391_s22 = scalar_lea.vmem [#allocation5], %s2324_s1 }
  0x3d   : > { %s389_s15 = scalar_lea.sflag [#allocation6], %s388_s8 }
  0x3e   : > { %2102 = dma.done.wait (%p2261_p12), %s389_s15, 32  }
  0x3f   : > { %2104 = vsyncadd (%p2261_p12), %s389_s15, 4294967264  ;;  %s400_s26 = scalar_lea.vmem [#allocation7], %s2324_s1 }
  0x40   : > { %2106 = dma.done.wait (%p67_p1), [#allocation9], 2048  }
  0x41   : > { %2108 = vsyncadd (%p67_p1), [#allocation9], 4294965248  ;;  %v1544_v0 = vld [vmem:[#allocation8 + $0x38] sm:$0xff]  ;;  %v1543_v2 = vld [vmem:[#allocation8 + $0x30] sm:$0xff]  ;;  %s2467_s20 = scalar_lea.vmem [#allocation11], %s2327_s5  ;;  %s2471_s17 = scalar_lea.vmem [#allocation12], %s2327_s5 }
  0x42   : > { %v1552_v1 = vld [vmem:[#allocation10 + $0x38] sm:$0xff]  ;;  %680 = vmatpush.bf16.msra.mxu0 %v1544_v0  ;;  %1745 = vmatpush.bf16.msra.mxu2 %v1544_v0  ;;  %v1551_v3 = vld [vmem:[#allocation10 + $0x30] sm:$0xff]  ;;  %v1542_v4 = vld [vmem:[#allocation8 + $0x28] sm:$0xff]  ;;  %s1553_s23 = sshll.u32 %s2131_s30, 7  ;;  %s1170_s12 = sshll.u32 %s2467_s20, 4  ;;  %s2568_s12 = int_to_ptr.vmem [resolvable:$true] %s1170_s12 }
  0x43   : > { %933 = vmatpush.bf16.msra.mxu1 %v1552_v1  ;;  %1753 = vmatpush.bf16.msra.mxu3 %v1552_v1  ;;  %v1550_v5 = vld [vmem:[#allocation10 + $0x28] sm:$0xff]  ;;  %v1541_v6 = vld [vmem:[#allocation8 + $0x20] sm:$0xff]  ;;  %v1540_v8 = vld [vmem:[#allocation8 + $0x18] sm:$0xff]  ;;  %s1169_s29 = scalar_lea.hbm %s2635_s7, %s1553_s23  ;;  %s2672_s18 = sld [smem:[#allocation29_spill]] }
  0x44   : > { %v1549_v7 = vld [vmem:[#allocation10 + $0x20] sm:$0xff]  ;;  %v1548_v11 = vld [vmem:[#allocation10 + $0x18] sm:$0xff]  ;;  %v1539_v17 = vld [vmem:[#allocation8 + $0x10] sm:$0xff]  ;;  %s1172_s21 = sshll.u32 %s1169_s29, 4  ;;  %s1189_s27 = sshll.u32 %s2471_s17, 4  ;;  %s1173_s21 = int_to_ptr.hbm [resolvable:$true] %s1172_s21  ;;  %s2574_s27 = int_to_ptr.vmem [resolvable:$true] %s1189_s27 }
  0x45   : > { %v460_v9 = vld [vmem:[%s2331_s25] sm:$0xff]   ;;  %v1547_v18 = vld [vmem:[#allocation10 + $0x10] sm:$0xff]  ;;  %v1538_v24 = vld [vmem:[#allocation8 + $0x8] sm:$0xff]  ;;  %s1151_s8 = scalar_lea.sflag [#allocation4], %s2324_s1  ;;  %s2031_s15 = sshra.s32 %s1173_s21, 4  ;;  %s2032_s15 = int_to_ptr.hbm [resolvable:$true] %s2031_s15 }
  0x46   : > { %681 = vmatpush.bf16.msra.mxu0 %v1543_v2  ;;  %1746 = vmatpush.bf16.msra.mxu2 %v1543_v2  ;;  %v476_v10 = vld [vmem:[%s2331_s25 + $0x40] sm:$0xff]   ;;  %v492_v12 = vunpack.c.l.bf16 %v460_v9  ;;  %v493_v13 = vunpack.c.h.bf16 %v460_v9  ;;  %v1546_v25 = vld [vmem:[#allocation10 + $0x8] sm:$0xff]  ;;  %v482_v9 = vld [vmem:[%s2331_s25 + $0x58] sm:$0xff]   ;;  %s2037_s24 = scalar_lea.hbm %s2635_s7, 256  ;;  %p2038_p6 = scmp.lt.s32.totalorder %s2032_s15, %s2635_s7 }
  0x47   : > { %934 = vmatpush.bf16.msra.mxu1 %v1551_v3  ;;  %1754 = vmatpush.bf16.msra.mxu3 %v1551_v3  ;;  %v2352_v14 = vld [vmem:[%s391_s22] ss:$0 sm:$0xff]  ;;  %v508_v15 = vunpack.c.l.bf16 %v476_v10  ;;  %v509_v16 = vunpack.c.h.bf16 %v476_v10  ;;  %v1537_v30 = vld [vmem:[#allocation8] sm:$0xff]  ;;  %v464_v54 = vld [vmem:[%s2331_s25 + $0x10] sm:$0xff]   ;;  %s2033_s22 = scalar_lea.hbm %s2032_s15, 128 }
  0x48   : > { %v528_v19 = vmul.f32 %v2352_v14, %v492_v12  ;;  %v529_v20 = vmul.f32 %v2352_v14, %v493_v13  ;;  %v2358_v21 = vld [vmem:[%s400_s26] ss:$0 sm:$0xff]  ;;  %v1545_v31 = vld [vmem:[#allocation10] sm:$0xff]  ;;  %v480_v55 = vld [vmem:[%s2331_s25 + $0x50] sm:$0xff]   ;;  %v496_v56 = vunpack.c.l.bf16 %v464_v54  ;;  %v497_v57 = vunpack.c.h.bf16 %v464_v54  ;;  %p2034_p1 = scmp.ne.s32.totalorder %s2032_s15, %s2033_s22  ;;  %p2039_p8 = scmp.lt.s32.totalorder %s2037_s24, %s2033_s22 }
  0x49   : > { %v544_v22 = vmul.f32 %v2352_v14, %v508_v15  ;;  %v545_v23 = vmul.f32 %v2352_v14, %v509_v16  ;;  %v1521_v34 = vld [vmem:[%s2331_s25] sm:$0xff]  ;;  %v462_v36 = vld [vmem:[%s2331_s25 + $0x8] sm:$0xff]   ;;  %v512_v58 = vunpack.c.l.bf16 %v480_v55  ;;  %v513_v59 = vunpack.c.h.bf16 %v480_v55  ;;  %s1188_s13 = scalar_lea.hbm %s2672_s18, %s1553_s23 }
  0x4a   : > { %682 = vmatpush.bf16.msra.mxu0 %v1542_v4  ;;  %1747 = vmatpush.bf16.msra.mxu2 %v1542_v4  ;;  %v564_v26 = vadd.f32 %v2358_v21, %v528_v19  ;;  %v565_v27 = vadd.f32 %v2358_v21, %v529_v20  ;;  %v1529_v35 = vld [vmem:[%s2331_s25 + $0x40] sm:$0xff]  ;;  %v478_v37 = vld [vmem:[%s2331_s25 + $0x48] sm:$0xff]   ;;  %v494_v38 = vunpack.c.l.bf16 %v462_v36  ;;  %v495_v39 = vunpack.c.h.bf16 %v462_v36  ;;  %p2035_p3 = pnand %p2034_p1, %p2268_p4  ;;  %p2040_p10 = por %p2039_p8, %p2038_p6 }
  0x4b   : > { %935 = vmatpush.bf16.msra.mxu1 %v1550_v5  ;;  %1755 = vmatpush.bf16.msra.mxu3 %v1550_v5  ;;  %v580_v28 = vadd.f32 %v2358_v21, %v544_v22  ;;  %v581_v29 = vadd.f32 %v2358_v21, %v545_v23  ;;  %v510_v40 = vunpack.c.l.bf16 %v478_v37  ;;  %v511_v41 = vunpack.c.h.bf16 %v478_v37  ;;  %v1522_v52 = vld [vmem:[%s2331_s25 + $0x8] sm:$0xff] }
  0x4c   : > { %v596_v32 = vpack.c.bf16 %v565_v27, %v564_v26  ;;  %v530_v42 = vmul.f32 %v2352_v14, %v494_v38  ;;  %v531_v43 = vmul.f32 %v2352_v14, %v495_v39  ;;  %v1530_v53 = vld [vmem:[%s2331_s25 + $0x48] sm:$0xff]  ;;  %v532_v60 = vmul.f32 %v2352_v14, %v496_v56  ;;  %v1524_v26 = vld [vmem:[%s2331_s25 + $0x18] sm:$0xff]  ;;  %p2036_p5 = pneg %p2035_p3 }
  0x4d   : > { %v604_v33 = vpack.c.bf16 %v581_v29, %v580_v28  ;;  %v546_v44 = vmul.f32 %v2352_v14, %v510_v40  ;;  %v547_v45 = vmul.f32 %v2352_v14, %v511_v41  ;;  %v533_v61 = vmul.f32 %v2352_v14, %v497_v57  ;;  %v1532_v27 = vld [vmem:[%s2331_s25 + $0x58] sm:$0xff]  ;;  %v468_v28 = vld [vmem:[%s2331_s25 + $0x20] sm:$0xff]  }
  0x4e   : > { %683 = vmatpush.bf16.msra.mxu0 %v1541_v6  ;;  %1748 = vmatpush.bf16.msra.mxu2 %v1541_v6  ;;  %v566_v46 = vadd.f32 %v2358_v21, %v530_v42  ;;  %v567_v47 = vadd.f32 %v2358_v21, %v531_v43  ;;  %v548_v62 = vmul.f32 %v2352_v14, %v512_v58  ;;  %v1523_v6 = vld [vmem:[%s2331_s25 + $0x10] sm:$0xff]  ;;  %v514_v12 = vunpack.c.l.bf16 %v482_v9  ;;  %v484_v29 = vld [vmem:[%s2331_s25 + $0x60] sm:$0xff]   ;;  %p2041_p11 = pnand %p2040_p10, %p2036_p5 }
  0x4f   : > { %936 = vmatpush.bf16.msra.mxu1 %v1549_v7  ;;  %1756 = vmatpush.bf16.msra.mxu3 %v1549_v7  ;;  %v582_v48 = vadd.f32 %v2358_v21, %v546_v44  ;;  %v583_v49 = vadd.f32 %v2358_v21, %v547_v45  ;;  %v549_v63 = vmul.f32 %v2352_v14, %v513_v59  ;;  %v1531_v7 = vld [vmem:[%s2331_s25 + $0x50] sm:$0xff]  ;;  %v515_v13 = vunpack.c.h.bf16 %v482_v9  ;;  %v1525_v44 = vld [vmem:[%s2331_s25 + $0x20] sm:$0xff] }
  0x50   : > { %v597_v50 = vpack.c.bf16 %v567_v47, %v566_v46  ;;  %v568_v0 = vadd.f32 %v2358_v21, %v532_v60  ;;  %v569_v1 = vadd.f32 %v2358_v21, %v533_v61  ;;  %v584_v2 = vadd.f32 %v2358_v21, %v548_v62  ;;  %v1533_v45 = vld [vmem:[%s2331_s25 + $0x60] sm:$0xff]  ;;  %v470_v46 = vld [vmem:[%s2331_s25 + $0x28] sm:$0xff]  }
  0x51   : > { %v605_v51 = vpack.c.bf16 %v583_v49, %v582_v48  ;;  %v585_v3 = vadd.f32 %v2358_v21, %v549_v63  ;;  %v486_v47 = vld [vmem:[%s2331_s25 + $0x68] sm:$0xff]   ;;  %v502_v48 = vunpack.c.l.bf16 %v470_v46  ;;  %v503_v49 = vunpack.c.h.bf16 %v470_v46 }
  0x52   : > { %684 = vmatpush.bf16.msra.mxu0 %v1540_v8  ;;  %1749 = vmatpush.bf16.msra.mxu2 %v1540_v8  ;;  %v598_v4 = vpack.c.bf16 %v569_v1, %v568_v0  ;;  %v466_v8 = vld [vmem:[%s2331_s25 + $0x18] sm:$0xff]   ;;  %v1526_v62 = vld [vmem:[%s2331_s25 + $0x28] sm:$0xff]  ;;  %v472_v0 = vld [vmem:[%s2331_s25 + $0x30] sm:$0xff]  }
  0x53   : > { %937 = vmatpush.bf16.msra.mxu1 %v1548_v11  ;;  %1757 = vmatpush.bf16.msra.mxu3 %v1548_v11  ;;  %v606_v5 = vpack.c.bf16 %v585_v3, %v584_v2  ;;  %v498_v10 = vunpack.c.l.bf16 %v466_v8  ;;  %v499_v11 = vunpack.c.h.bf16 %v466_v8  ;;  %v1534_v63 = vld [vmem:[%s2331_s25 + $0x68] sm:$0xff]  ;;  %v488_v1 = vld [vmem:[%s2331_s25 + $0x70] sm:$0xff]   ;;  %v504_v2 = vunpack.c.l.bf16 %v472_v0 }
  0x54   : > { %v505_v3 = vunpack.c.h.bf16 %v472_v0 }
  0x55   : > { %v534_v15 = vmul.f32 %v2352_v14, %v498_v10  ;;  %v535_v16 = vmul.f32 %v2352_v14, %v499_v11 }
  0x56   : > { %685 = vmatpush.bf16.msra.mxu0 %v1539_v17  ;;  %1750 = vmatpush.bf16.msra.mxu2 %v1539_v17  ;;  %v550_v17 = vmul.f32 %v2352_v14, %v514_v12 }
  0x57   : > { %938 = vmatpush.bf16.msra.mxu1 %v1547_v18  ;;  %1758 = vmatpush.bf16.msra.mxu3 %v1547_v18  ;;  %v551_v18 = vmul.f32 %v2352_v14, %v515_v13  ;;  %v570_v19 = vadd.f32 %v2358_v21, %v534_v15  ;;  %v571_v20 = vadd.f32 %v2358_v21, %v535_v16 }
  0x58   : > { %v586_v22 = vadd.f32 %v2358_v21, %v550_v17  ;;  %v1527_v17 = vld [vmem:[%s2331_s25 + $0x30] sm:$0xff] }
  0x59   : > { %v587_v23 = vadd.f32 %v2358_v21, %v551_v18  ;;  %v1535_v18 = vld [vmem:[%s2331_s25 + $0x70] sm:$0xff] }
  0x5a   : > { %686 = vmatpush.bf16.msra.mxu0 %v1538_v24  ;;  %1751 = vmatpush.bf16.msra.mxu2 %v1538_v24  ;;  %v599_v24 = vpack.c.bf16 %v571_v20, %v570_v19  ;;  %v474_v19 = vld [vmem:[%s2331_s25 + $0x38] sm:$0xff]  }
  0x5b   : > { %939 = vmatpush.bf16.msra.mxu1 %v1546_v25  ;;  %1759 = vmatpush.bf16.msra.mxu3 %v1546_v25  ;;  %v607_v25 = vpack.c.bf16 %v587_v23, %v586_v22  ;;  %v490_v20 = vld [vmem:[%s2331_s25 + $0x78] sm:$0xff]   ;;  %v506_v22 = vunpack.c.l.bf16 %v474_v19  ;;  %v507_v23 = vunpack.c.h.bf16 %v474_v19 }
  0x5e   : > { %687 = vmatpush.bf16.msra.mxu0 %v1537_v30  ;;  %1752 = vmatpush.bf16.msra.mxu2 %v1537_v30  ;;  %v500_v30 = vunpack.c.l.bf16 %v468_v28 }
  0x5f   : > { %940 = vmatpush.bf16.msra.mxu1 %v1545_v31  ;;  %1760 = vmatpush.bf16.msra.mxu3 %v1545_v31  ;;  %v501_v31 = vunpack.c.h.bf16 %v468_v28 }
  0x61   : > { %688 = vmatmul.bf16.vlgmr.msra.gmra.mxu0 %v596_v32  ;;  %728 = vmatmul.bf16.vlgmr.msra.gmra.mxu2 %v604_v33  ;;  %v516_v32 = vunpack.c.l.bf16 %v484_v29  ;;  %v517_v33 = vunpack.c.h.bf16 %v484_v29 }
  0x62   : > { %941 = vmatmul.bf16.vlgmr.msra.gmra.mxu1 %v1521_v34  ;;  %981 = vmatmul.bf16.vlgmr.msra.gmra.mxu3 %v1529_v35  ;;  %v536_v34 = vmul.f32 %v2352_v14, %v500_v30  ;;  %v537_v35 = vmul.f32 %v2352_v14, %v501_v31 }
  0x63   : > { %v552_v36 = vmul.f32 %v2352_v14, %v516_v32  ;;  %v553_v37 = vmul.f32 %v2352_v14, %v517_v33 }
  0x64   : > { %v572_v38 = vadd.f32 %v2358_v21, %v536_v34  ;;  %v573_v39 = vadd.f32 %v2358_v21, %v537_v35 }
  0x65   : > { %v588_v40 = vadd.f32 %v2358_v21, %v552_v36  ;;  %v589_v41 = vadd.f32 %v2358_v21, %v553_v37  ;;  %v1528_v36 = vld [vmem:[%s2331_s25 + $0x38] sm:$0xff] }
  0x66   : > { %v600_v42 = vpack.c.bf16 %v573_v39, %v572_v38  ;;  %v1536_v37 = vld [vmem:[%s2331_s25 + $0x78] sm:$0xff]  ;;  %v2455_v39 = vld [vmem:[%s2632_s4] ss:$0 sm:$0xff]  ;;  %s1191_s25 = sshll.u32 %s1188_s13, 4  ;;  %s2576_s25 = int_to_ptr.hbm [resolvable:$true] %s1191_s25 }
  0x67   : > { %v608_v43 = vpack.c.bf16 %v589_v41, %v588_v40 }
  0x71   : > { %693 = vmatmul.bf16.gmra.mxu0 %v597_v50  ;;  %733 = vmatmul.bf16.gmra.mxu2 %v605_v51  ;;  %v518_v50 = vunpack.c.l.bf16 %v486_v47  ;;  %v519_v51 = vunpack.c.h.bf16 %v486_v47 }
  0x72   : > { %946 = vmatmul.bf16.gmra.mxu1 %v1522_v52  ;;  %986 = vmatmul.bf16.gmra.mxu3 %v1530_v53  ;;  %v538_v52 = vmul.f32 %v2352_v14, %v502_v48  ;;  %v539_v53 = vmul.f32 %v2352_v14, %v503_v49 }
  0x73   : > { %v554_v54 = vmul.f32 %v2352_v14, %v518_v50  ;;  %v555_v55 = vmul.f32 %v2352_v14, %v519_v51 }
  0x74   : > { %v574_v56 = vadd.f32 %v2358_v21, %v538_v52  ;;  %v575_v57 = vadd.f32 %v2358_v21, %v539_v53 }
  0x75   : > { %v590_v58 = vadd.f32 %v2358_v21, %v554_v54  ;;  %v591_v59 = vadd.f32 %v2358_v21, %v555_v55 }
  0x76   : > { %v601_v60 = vpack.c.bf16 %v575_v57, %v574_v56 }
  0x77   : > { %v609_v61 = vpack.c.bf16 %v591_v59, %v590_v58 }
  0x81   : > { %698 = vmatmul.bf16.gmra.mxu0 %v598_v4  ;;  %738 = vmatmul.bf16.gmra.mxu2 %v606_v5  ;;  %v520_v4 = vunpack.c.l.bf16 %v488_v1  ;;  %v521_v5 = vunpack.c.h.bf16 %v488_v1 }
  0x82   : > { %951 = vmatmul.bf16.gmra.mxu1 %v1523_v6  ;;  %991 = vmatmul.bf16.gmra.mxu3 %v1531_v7  ;;  %v540_v6 = vmul.f32 %v2352_v14, %v504_v2  ;;  %v541_v7 = vmul.f32 %v2352_v14, %v505_v3 }
  0x83   : > { %v556_v8 = vmul.f32 %v2352_v14, %v520_v4  ;;  %v557_v9 = vmul.f32 %v2352_v14, %v521_v5 }
  0x84   : > { %v576_v10 = vadd.f32 %v2358_v21, %v540_v6  ;;  %v577_v11 = vadd.f32 %v2358_v21, %v541_v7 }
  0x85   : > { %v592_v12 = vadd.f32 %v2358_v21, %v556_v8  ;;  %v593_v13 = vadd.f32 %v2358_v21, %v557_v9 }
  0x86   : > { %v602_v15 = vpack.c.bf16 %v577_v11, %v576_v10 }
  0x87   : > { %v610_v16 = vpack.c.bf16 %v593_v13, %v592_v12 }
  0x91   : > { %703 = vmatmul.bf16.gmra.mxu0 %v599_v24  ;;  %743 = vmatmul.bf16.gmra.mxu2 %v607_v25  ;;  %v522_v24 = vunpack.c.l.bf16 %v490_v20  ;;  %v523_v25 = vunpack.c.h.bf16 %v490_v20 }
  0x92   : > { %956 = vmatmul.bf16.gmra.mxu1 %v1524_v26  ;;  %996 = vmatmul.bf16.gmra.mxu3 %v1532_v27  ;;  %v542_v26 = vmul.f32 %v2352_v14, %v506_v22  ;;  %v543_v27 = vmul.f32 %v2352_v14, %v507_v23 }
  0x93   : > { %v558_v28 = vmul.f32 %v2352_v14, %v522_v24  ;;  %v559_v29 = vmul.f32 %v2352_v14, %v523_v25 }
  0x94   : > { %v578_v30 = vadd.f32 %v2358_v21, %v542_v26  ;;  %v579_v31 = vadd.f32 %v2358_v21, %v543_v27 }
  0x95   : > { %v594_v32 = vadd.f32 %v2358_v21, %v558_v28  ;;  %v595_v33 = vadd.f32 %v2358_v21, %v559_v29  ;;  %v2460_v21 = vld [vmem:[%s2634_s6] ss:$0 sm:$0xff] }
  0x96   : > { %v603_v34 = vpack.c.bf16 %v579_v31, %v578_v30 }
  0x97   : > { %v611_v35 = vpack.c.bf16 %v595_v33, %v594_v32 }
  0xa1   : > { %708 = vmatmul.bf16.gmra.mxu0 %v600_v42  ;;  %748 = vmatmul.bf16.gmra.mxu2 %v608_v43 }
  0xa2   : > { %961 = vmatmul.bf16.gmra.mxu1 %v1525_v44  ;;  %1001 = vmatmul.bf16.gmra.mxu3 %v1533_v45 }
  0xb1   : > { %713 = vmatmul.bf16.gmra.mxu0 %v601_v60  ;;  %753 = vmatmul.bf16.gmra.mxu2 %v609_v61 }
  0xb2   : > { %966 = vmatmul.bf16.gmra.mxu1 %v1526_v62  ;;  %1006 = vmatmul.bf16.gmra.mxu3 %v1534_v63 }
  0xc1   : > { %718 = vmatmul.bf16.gmra.mxu0 %v602_v15  ;;  %758 = vmatmul.bf16.gmra.mxu2 %v610_v16 }
  0xc2   : > { %971 = vmatmul.bf16.gmra.mxu1 %v1527_v17  ;;  %1011 = vmatmul.bf16.gmra.mxu3 %v1535_v18 }
  0xd1   : > { %723 = vmatmul.bf16.gmra.mxu0 %v603_v34  ;;  %763 = vmatmul.bf16.gmra.mxu2 %v611_v35 }
  0xd2   : > { %976 = vmatmul.bf16.gmra.mxu1 %v1528_v36  ;;  %1016 = vmatmul.bf16.gmra.mxu3 %v1536_v37 }
  0xde   : > { %v689_v38 = vpop.f32.mrf.mxu0 }
  0xdf   : > { %v942_v14 = vpop.f32.mrf.mxu1  ;;  %v690_v43 = vadd.f32 %v2455_v39, %v689_v38 }
  0xe0   : > { %v943_v46 = vadd.f32 %v2460_v21, %v942_v14 }
  0xe4   : > { %v729_v40 = vpop.f32.mrf.mxu2 }
  0xe5   : > { %v982_v41 = vpop.f32.mrf.mxu3  ;;  %v730_v51 = vadd.f32 %v2455_v39, %v729_v40 }
  0xe6   : > { %v691_v42 = vpop.f32.mrf.mxu0  ;;  %v983_v54 = vadd.f32 %v2460_v21, %v982_v41 }
  0xe7   : > { %v692_v44 = vadd.f32 %v2455_v39, %v691_v42  ;;  %v944_v45 = vpop.f32.mrf.mxu1 }
  0xe8   : > { %v945_v47 = vadd.f32 %v2460_v21, %v944_v45 }
  0xe9   : > { %v1558_v48 = vpack.c.bf16 %v692_v44, %v690_v43 }
  0xea   : > { %v1638_v49 = vpack.c.bf16 %v945_v47, %v943_v46 }
  0xeb   : > { %1559 = vst [vmem:[%s2467_s20] sm:$0xff] %v1558_v48  }
  0xec   : > { %1639 = vst [vmem:[%s2471_s17] sm:$0xff] %v1638_v49   ;;  %v731_v50 = vpop.f32.mrf.mxu2 }
  0xed   : > { %v732_v52 = vadd.f32 %v2455_v39, %v731_v50  ;;  %v984_v53 = vpop.f32.mrf.mxu3 }
  0xee   : > { %v985_v55 = vadd.f32 %v2460_v21, %v984_v53  ;;  %v694_v56 = vpop.f32.mrf.mxu0 }
  0xef   : > { %v1598_v57 = vpack.c.bf16 %v732_v52, %v730_v51  ;;  %v947_v58 = vpop.f32.mrf.mxu1  ;;  %v695_v63 = vadd.f32 %v2455_v39, %v694_v56 }
  0xf0   : > { %v1678_v59 = vpack.c.bf16 %v985_v55, %v983_v54  ;;  %v948_v2 = vadd.f32 %v2460_v21, %v947_v58 }
  0xf1   : > { %1722 = vst [vmem:[%s2467_s20 + $0x40] sm:$0xff] %v1598_v57  }
  0xf2   : > { %1737 = vst [vmem:[%s2471_s17 + $0x40] sm:$0xff] %v1678_v59  }
  0xf4   : > { %v734_v60 = vpop.f32.mrf.mxu2 }
  0xf5   : > { %v987_v61 = vpop.f32.mrf.mxu3  ;;  %v735_v7 = vadd.f32 %v2455_v39, %v734_v60 }
  0xf6   : > { %v696_v62 = vpop.f32.mrf.mxu0  ;;  %v988_v10 = vadd.f32 %v2460_v21, %v987_v61 }
  0xf7   : > { %v697_v0 = vadd.f32 %v2455_v39, %v696_v62  ;;  %v949_v1 = vpop.f32.mrf.mxu1 }
  0xf8   : > { %v950_v3 = vadd.f32 %v2460_v21, %v949_v1 }
  0xf9   : > { %v1563_v4 = vpack.c.bf16 %v697_v0, %v695_v63 }
  0xfa   : > { %v1643_v5 = vpack.c.bf16 %v950_v3, %v948_v2 }
  0xfb   : > { %1715 = vst [vmem:[%s2467_s20 + $0x8] sm:$0xff] %v1563_v4  }
  0xfc   : > { %1730 = vst [vmem:[%s2471_s17 + $0x8] sm:$0xff] %v1643_v5   ;;  %v736_v6 = vpop.f32.mrf.mxu2 }
  0xfd   : > { %v737_v8 = vadd.f32 %v2455_v39, %v736_v6  ;;  %v989_v9 = vpop.f32.mrf.mxu3 }
  0xfe   : > { %v990_v11 = vadd.f32 %v2460_v21, %v989_v9  ;;  %v699_v12 = vpop.f32.mrf.mxu0 }
  0xff   : > { %v1603_v13 = vpack.c.bf16 %v737_v8, %v735_v7  ;;  %v952_v15 = vpop.f32.mrf.mxu1  ;;  %v700_v20 = vadd.f32 %v2455_v39, %v699_v12 }
 0x100   : > { %v1683_v16 = vpack.c.bf16 %v990_v11, %v988_v10  ;;  %v953_v24 = vadd.f32 %v2460_v21, %v952_v15 }
 0x101   : > { %1723 = vst [vmem:[%s2467_s20 + $0x48] sm:$0xff] %v1603_v13  }
 0x102   : > { %1738 = vst [vmem:[%s2471_s17 + $0x48] sm:$0xff] %v1683_v16  }
 0x104   : > { %v739_v17 = vpop.f32.mrf.mxu2 }
 0x105   : > { %v992_v18 = vpop.f32.mrf.mxu3  ;;  %v740_v29 = vadd.f32 %v2455_v39, %v739_v17 }
 0x106   : > { %v701_v19 = vpop.f32.mrf.mxu0  ;;  %v993_v32 = vadd.f32 %v2460_v21, %v992_v18 }
 0x107   : > { %v702_v22 = vadd.f32 %v2455_v39, %v701_v19  ;;  %v954_v23 = vpop.f32.mrf.mxu1 }
 0x108   : > { %v955_v25 = vadd.f32 %v2460_v21, %v954_v23 }
 0x109   : > { %v1568_v26 = vpack.c.bf16 %v702_v22, %v700_v20 }
 0x10a   : > { %v1648_v27 = vpack.c.bf16 %v955_v25, %v953_v24 }
 0x10b   : > { %1716 = vst [vmem:[%s2467_s20 + $0x10] sm:$0xff] %v1568_v26  }
 0x10c   : > { %1731 = vst [vmem:[%s2471_s17 + $0x10] sm:$0xff] %v1648_v27   ;;  %v741_v28 = vpop.f32.mrf.mxu2 }
 0x10d   : > { %v742_v30 = vadd.f32 %v2455_v39, %v741_v28  ;;  %v994_v31 = vpop.f32.mrf.mxu3 }
 0x10e   : > { %v995_v33 = vadd.f32 %v2460_v21, %v994_v31  ;;  %v704_v34 = vpop.f32.mrf.mxu0 }
 0x10f   : > { %v1608_v35 = vpack.c.bf16 %v742_v30, %v740_v29  ;;  %v957_v36 = vpop.f32.mrf.mxu1  ;;  %v705_v41 = vadd.f32 %v2455_v39, %v704_v34 }
 0x110   : > { %v1688_v37 = vpack.c.bf16 %v995_v33, %v993_v32  ;;  %v958_v44 = vadd.f32 %v2460_v21, %v957_v36 }
 0x111   : > { %1724 = vst [vmem:[%s2467_s20 + $0x50] sm:$0xff] %v1608_v35  }
 0x112   : > { %1739 = vst [vmem:[%s2471_s17 + $0x50] sm:$0xff] %v1688_v37  }
 0x114   : > { %v744_v38 = vpop.f32.mrf.mxu2 }
 0x115   : > { %v997_v14 = vpop.f32.mrf.mxu3  ;;  %v745_v49 = vadd.f32 %v2455_v39, %v744_v38 }
 0x116   : > { %v706_v40 = vpop.f32.mrf.mxu0  ;;  %v998_v52 = vadd.f32 %v2460_v21, %v997_v14 }
 0x117   : > { %v707_v42 = vadd.f32 %v2455_v39, %v706_v40  ;;  %v959_v43 = vpop.f32.mrf.mxu1 }
 0x118   : > { %v960_v45 = vadd.f32 %v2460_v21, %v959_v43 }
 0x119   : > { %v1573_v46 = vpack.c.bf16 %v707_v42, %v705_v41 }
 0x11a   : > { %v1653_v47 = vpack.c.bf16 %v960_v45, %v958_v44 }
 0x11b   : > { %1717 = vst [vmem:[%s2467_s20 + $0x18] sm:$0xff] %v1573_v46  }
 0x11c   : > { %1732 = vst [vmem:[%s2471_s17 + $0x18] sm:$0xff] %v1653_v47   ;;  %v746_v48 = vpop.f32.mrf.mxu2 }
 0x11d   : > { %v747_v50 = vadd.f32 %v2455_v39, %v746_v48  ;;  %v999_v51 = vpop.f32.mrf.mxu3 }
 0x11e   : > { %v1000_v53 = vadd.f32 %v2460_v21, %v999_v51  ;;  %v709_v54 = vpop.f32.mrf.mxu0 }
 0x11f   : > { %v1613_v55 = vpack.c.bf16 %v747_v50, %v745_v49  ;;  %v962_v56 = vpop.f32.mrf.mxu1  ;;  %v710_v61 = vadd.f32 %v2455_v39, %v709_v54 }
 0x120   : > { %v1693_v57 = vpack.c.bf16 %v1000_v53, %v998_v52  ;;  %v963_v0 = vadd.f32 %v2460_v21, %v962_v56 }
 0x121   : > { %1725 = vst [vmem:[%s2467_s20 + $0x58] sm:$0xff] %v1613_v55  }
 0x122   : > { %1740 = vst [vmem:[%s2471_s17 + $0x58] sm:$0xff] %v1693_v57  }
 0x124   : > { %v749_v58 = vpop.f32.mrf.mxu2 }
 0x125   : > { %v1002_v59 = vpop.f32.mrf.mxu3  ;;  %v750_v5 = vadd.f32 %v2455_v39, %v749_v58 }
 0x126   : > { %v711_v60 = vpop.f32.mrf.mxu0  ;;  %v1003_v8 = vadd.f32 %v2460_v21, %v1002_v59 }
 0x127   : > { %v712_v62 = vadd.f32 %v2455_v39, %v711_v60  ;;  %v964_v63 = vpop.f32.mrf.mxu1 }
 0x128   : > { %v965_v1 = vadd.f32 %v2460_v21, %v964_v63 }
 0x129   : > { %v1578_v2 = vpack.c.bf16 %v712_v62, %v710_v61 }
 0x12a   : > { %v1658_v3 = vpack.c.bf16 %v965_v1, %v963_v0 }
 0x12b   : > { %1718 = vst [vmem:[%s2467_s20 + $0x20] sm:$0xff] %v1578_v2  }
 0x12c   : > { %1733 = vst [vmem:[%s2471_s17 + $0x20] sm:$0xff] %v1658_v3   ;;  %v751_v4 = vpop.f32.mrf.mxu2 }
 0x12d   : > { %v752_v6 = vadd.f32 %v2455_v39, %v751_v4  ;;  %v1004_v7 = vpop.f32.mrf.mxu3 }
 0x12e   : > { %v1005_v9 = vadd.f32 %v2460_v21, %v1004_v7  ;;  %v714_v10 = vpop.f32.mrf.mxu0 }
 0x12f   : > { %v1618_v11 = vpack.c.bf16 %v752_v6, %v750_v5  ;;  %v967_v12 = vpop.f32.mrf.mxu1  ;;  %v715_v18 = vadd.f32 %v2455_v39, %v714_v10 }
 0x130   : > { %v1698_v13 = vpack.c.bf16 %v1005_v9, %v1003_v8  ;;  %v968_v22 = vadd.f32 %v2460_v21, %v967_v12 }
 0x131   : > { %1726 = vst [vmem:[%s2467_s20 + $0x60] sm:$0xff] %v1618_v11  }
 0x132   : > { %1741 = vst [vmem:[%s2471_s17 + $0x60] sm:$0xff] %v1698_v13  }
 0x134   : > { %v754_v15 = vpop.f32.mrf.mxu2 }
 0x135   : > { %v1007_v16 = vpop.f32.mrf.mxu3  ;;  %v755_v27 = vadd.f32 %v2455_v39, %v754_v15 }
 0x136   : > { %v716_v17 = vpop.f32.mrf.mxu0  ;;  %v1008_v30 = vadd.f32 %v2460_v21, %v1007_v16 }
 0x137   : > { %v717_v19 = vadd.f32 %v2455_v39, %v716_v17  ;;  %v969_v20 = vpop.f32.mrf.mxu1 }
 0x138   : > { %v970_v23 = vadd.f32 %v2460_v21, %v969_v20 }
 0x139   : > { %v1583_v24 = vpack.c.bf16 %v717_v19, %v715_v18 }
 0x13a   : > { %v1663_v25 = vpack.c.bf16 %v970_v23, %v968_v22 }
 0x13b   : > { %1719 = vst [vmem:[%s2467_s20 + $0x28] sm:$0xff] %v1583_v24  }
 0x13c   : > { %1734 = vst [vmem:[%s2471_s17 + $0x28] sm:$0xff] %v1663_v25   ;;  %v756_v26 = vpop.f32.mrf.mxu2 }
 0x13d   : > { %v757_v28 = vadd.f32 %v2455_v39, %v756_v26  ;;  %v1009_v29 = vpop.f32.mrf.mxu3 }
 0x13e   : > { %v1010_v31 = vadd.f32 %v2460_v21, %v1009_v29  ;;  %v719_v32 = vpop.f32.mrf.mxu0 }
 0x13f   : > { %v1623_v33 = vpack.c.bf16 %v757_v28, %v755_v27  ;;  %v972_v34 = vpop.f32.mrf.mxu1  ;;  %v720_v14 = vadd.f32 %v2455_v39, %v719_v32 }
 0x140   : > { %v1703_v35 = vpack.c.bf16 %v1010_v31, %v1008_v30  ;;  %v973_v42 = vadd.f32 %v2460_v21, %v972_v34 }
 0x141   : > { %1727 = vst [vmem:[%s2467_s20 + $0x68] sm:$0xff] %v1623_v33  }
 0x142   : > { %1742 = vst [vmem:[%s2471_s17 + $0x68] sm:$0xff] %v1703_v35  }
 0x144   : > { %v759_v36 = vpop.f32.mrf.mxu2 }
 0x145   : > { %v1012_v37 = vpop.f32.mrf.mxu3  ;;  %v760_v47 = vadd.f32 %v2455_v39, %v759_v36 }
 0x146   : > { %v721_v38 = vpop.f32.mrf.mxu0  ;;  %v1013_v50 = vadd.f32 %v2460_v21, %v1012_v37 }
 0x147   : > { %v722_v40 = vadd.f32 %v2455_v39, %v721_v38  ;;  %v974_v41 = vpop.f32.mrf.mxu1 }
 0x148   : > { %v975_v43 = vadd.f32 %v2460_v21, %v974_v41 }
 0x149   : > { %v1588_v44 = vpack.c.bf16 %v722_v40, %v720_v14 }
 0x14a   : > { %v1668_v45 = vpack.c.bf16 %v975_v43, %v973_v42 }
 0x14b   : > { %1720 = vst [vmem:[%s2467_s20 + $0x30] sm:$0xff] %v1588_v44  }
 0x14c   : > { %1735 = vst [vmem:[%s2471_s17 + $0x30] sm:$0xff] %v1668_v45   ;;  %v761_v46 = vpop.f32.mrf.mxu2 }
 0x14d   : > { %v762_v48 = vadd.f32 %v2455_v39, %v761_v46  ;;  %v1014_v49 = vpop.f32.mrf.mxu3 }
 0x14e   : > { %v1015_v51 = vadd.f32 %v2460_v21, %v1014_v49  ;;  %v724_v52 = vpop.f32.mrf.mxu0 }
 0x14f   : > { %v1628_v53 = vpack.c.bf16 %v762_v48, %v760_v47  ;;  %v977_v54 = vpop.f32.mrf.mxu1  ;;  %v725_v59 = vadd.f32 %v2455_v39, %v724_v52 }
 0x150   : > { %v1708_v55 = vpack.c.bf16 %v1015_v51, %v1013_v50  ;;  %v978_v62 = vadd.f32 %v2460_v21, %v977_v54 }
 0x151   : > { %1728 = vst [vmem:[%s2467_s20 + $0x70] sm:$0xff] %v1628_v53  }
 0x152   : > { %1743 = vst [vmem:[%s2471_s17 + $0x70] sm:$0xff] %v1708_v55  }
 0x154   : > { %v764_v56 = vpop.f32.mrf.mxu2 }
 0x155   : > { %v1017_v57 = vpop.f32.mrf.mxu3  ;;  %v765_v3 = vadd.f32 %v2455_v39, %v764_v56 }
 0x156   : > { %v726_v58 = vpop.f32.mrf.mxu0  ;;  %v1018_v6 = vadd.f32 %v2460_v21, %v1017_v57 }
 0x157   : > { %v727_v60 = vadd.f32 %v2455_v39, %v726_v58  ;;  %v979_v61 = vpop.f32.mrf.mxu1 }
 0x158   : > { %v980_v63 = vadd.f32 %v2460_v21, %v979_v61 }
 0x159   : > { %v1593_v0 = vpack.c.bf16 %v727_v60, %v725_v59 }
 0x15a   : > { %v1673_v1 = vpack.c.bf16 %v980_v63, %v978_v62 }
 0x15b   : > { %1721 = vst [vmem:[%s2467_s20 + $0x38] sm:$0xff] %v1593_v0  }
 0x15c   : > { %1736 = vst [vmem:[%s2471_s17 + $0x38] sm:$0xff] %v1673_v1   ;;  %v766_v2 = vpop.f32.mrf.mxu2 }
 0x15d   : > { %v767_v4 = vadd.f32 %v2455_v39, %v766_v2  ;;  %v1019_v5 = vpop.f32.mrf.mxu3 }
 0x15e   : > { %v1020_v7 = vadd.f32 %v2460_v21, %v1019_v5 }
 0x15f   : > { %v1633_v8 = vpack.c.bf16 %v767_v4, %v765_v3 }
 0x160   : > { %v1713_v9 = vpack.c.bf16 %v1020_v7, %v1018_v6 }
 0x161   : > { %1729 = vst [vmem:[%s2467_s20 + $0x78] sm:$0xff] %v1633_v8  }
 0x162   : > { %1744 = vst [vmem:[%s2471_s17 + $0x78] sm:$0xff] %v1713_v9  }
 0x163   : > { %2044 = shalt.err (!%p2041_p11)
}
 0x164   : > { %s2145_s20 = smov 64   ;;  %s2146_s17 = smov 4  }
 0x165   : > { %1775 = dma.vmem_to_hbm [thread:$0]  (%p2268_p4), %s2568_s12, 2048, %s1173_s21, %s1151_s8, %s2145_s20, %s2145_s20, %s2146_s17  }
 0x166   : > { %s1156_s23 = scalar_lea.sflag [#allocation13], %s2324_s1  ;;  %s2059_s3 = sshra.s32 %s2576_s25, 4  ;;  %s2060_s3 = int_to_ptr.hbm [resolvable:$true] %s2059_s3 }
 0x167   : > { %s2061_s19 = scalar_lea.hbm %s2060_s3, 128  ;;  %s2065_s30 = scalar_lea.hbm %s2672_s18, 256 }
 0x168   : > { %p2062_p12 = scmp.ne.s32.totalorder %s2060_s3, %s2061_s19  ;;  %p2066_p2 = scmp.lt.s32.totalorder %s2060_s3, %s2672_s18 }
 0x169   : > { %p2067_p9 = scmp.lt.s32.totalorder %s2065_s30, %s2061_s19 }
 0x16a   : > { %p2063_p13 = pnand %p2062_p12, %p2268_p4 }
 0x16b   : > { %p2068_p1 = por %p2067_p9, %p2066_p2 }
 0x16c   : > { %p2064_p0 = pneg %p2063_p13 }
 0x16e   : > { %p2069_p3 = pnand %p2068_p1, %p2064_p0 }
 0x170   : > { %2072 = shalt.err (!%p2069_p3)
}
 0x171   : > { %1776 = dma.vmem_to_hbm [thread:$0]  (%p2268_p4), %s2574_s27, 2048, %s2576_s25, %s1156_s23, %s2145_s20, %s2145_s20, %s2146_s17  }
 0x172 PF: > { %s2674_s1 = sld [smem:[#allocation19_spill]] }
 0x173   : > { %s2676_s21 = sld [smem:[#allocation21_spill]] }
 0x178   : > { %s1206_s8 = sand.u32 1, %s2674_s1  }
 0x179   : > { %p2677_p5 = scmp.ge.s32.totalorder %s2676_s21, 2  ;;  %s1207_s22 = scalar_lea.sflag [#allocation4], %s1206_s8 }
 0x17b   : > { %p1797_p6 = pnand %p2677_p5, %p2276_p7 }
 0x17d   : > { %p1798_p8 = pneg %p1797_p6 }
 0x17f   : > { %2110 = dma.done.wait (%p1798_p8), %s1207_s22, 2048  }
 0x180   : > { %2112 = vsyncadd (%p1798_p8), %s1207_s22, 4294965248  ;;  %s1217_s26 = scalar_lea.sflag [#allocation13], %s1206_s8 }
 0x181   : > { %2114 = dma.done.wait (%p1798_p8), %s1217_s26, 2048  }
 0x182   : > { %2116 = vsyncadd (%p1798_p8), %s1217_s26, 4294965248  ;;  %s32_s10 = sadd.s32 1, %s2676_s21   ;;  %s2678_s5 = sld [smem:[#allocation20_spill]] }
 0x183   : > { %p29_p10 = scmp.ge.s32.totalorder %s32_s10, 4   ;;  %s2679_s29 = sld [smem:[#allocation24_spill]] }
 0x184   : > { %s2680_s25 = sld [smem:[#allocation22_spill]]  ;;  %s2681_s27 = smov %s2123_s28 }
 0x185   : > { %s2683_s30 = smov %s2135_s9 }
 0x186   :  { %31 = sbr.rel (!%p29_p10) target bundleno = 16 (0x10), region = 142 }
 0x188   : > { %s2682_s28 = smov %s2678_s5 }
 0x18a   : > { %s2684_s9 = smov %s2680_s25 }
 0x18b   :  { %1223 = vsyncpa [#allocation3], 1 }
 0x18c   :  { %1225 = vsyncpa [#allocation3 + $0x1], 1 }
 0x18d   :  { %1226 = vsyncpa [#allocation6], 1 }
 0x18e   :  { %1228 = vsyncpa [#allocation6 + $0x1], 1 }
 0x18f   :  { %1229 = vsyncpa [#allocation9], 1 }
 0x190   :  { %1230 = vsyncpa [#allocation4], 1 }
 0x191   :  { %1232 = vsyncpa [#allocation4 + $0x1], 1 }
 0x192   :  { %1233 = vsyncpa [#allocation13], 1 }
 0x193   :  { %1235 = vsyncpa [#allocation13 + $0x1], 1 }

</bundles_post_ra>
